<compile_context>
chip_gen: v5e
topology: v5e:2x2
jax: 0.10.0
libtpu: 0.0.40
codegen_flags: <defaults>
</compile_context>

<pallas_src>
import functools

import jax
import jax.numpy as jnp
from jax import lax
from jax.experimental import pallas as pl
from jax.experimental.pallas import tpu as pltpu


def _round_up(x, m):
    return ((x + m - 1) // m) * m


# -----------------------------------------------------------------------------
# Pallas kernel: K-tiled  out = A @ B + bias  (optional ReLU)
# -----------------------------------------------------------------------------
def _matmul_bias_kernel(a_ref, b_ref, bias_ref, o_ref, acc_ref, *, apply_relu):
    k = pl.program_id(1)

    @pl.when(k == 0)
    def _():
        # bias folded into accumulator init (saves a separate VPU add per tile)
        acc_ref[...] = jnp.broadcast_to(
            bias_ref[...].astype(jnp.float32), acc_ref.shape)

    acc_ref[...] += jnp.dot(a_ref[...], b_ref[...],
                            preferred_element_type=jnp.float32)

    @pl.when(k == pl.num_programs(1) - 1)
    def _():
        acc = acc_ref[...]
        if apply_relu:
            acc = jnp.maximum(acc, 0.0)
        o_ref[...] = acc.astype(o_ref.dtype)


def matmul_bias(a, b, bias, *, apply_relu=False, out_dtype=jnp.float32,
                tm=256, tk=1024):
    """a: (M, K), b: (K, N), bias: (N,) -> (M, N), Pallas K-tiled matmul."""
    M, K = a.shape
    K2, N = b.shape
    assert K == K2

    tm = min(tm, _round_up(M, 8))          # don't over-pad tiny M
    tk = min(tk, _round_up(K, 128))        # tk multiple of 128 (lane tiling)
    m_pad, k_pad = _round_up(M, tm), _round_up(K, tk)
    if (m_pad, k_pad) != (M, K):
        a = jnp.pad(a, ((0, m_pad - M), (0, k_pad - K)))
    if k_pad != K:
        b = jnp.pad(b, ((0, k_pad - K), (0, 0)))
    bias2 = bias.reshape(1, N).astype(jnp.float32)

    cost = pl.CostEstimate(
        flops=2 * m_pad * k_pad * N,
        transcendentals=0,
        bytes_accessed=(a.size * a.dtype.itemsize
                        + b.size * b.dtype.itemsize
                        + bias2.size * 4
                        + m_pad * N * jnp.dtype(out_dtype).itemsize))

    out = pl.pallas_call(
        functools.partial(_matmul_bias_kernel, apply_relu=apply_relu),
        out_shape=jax.ShapeDtypeStruct((m_pad, N), out_dtype),
        grid_spec=pltpu.PrefetchScalarGridSpec(
            num_scalar_prefetch=0,
            grid=(m_pad // tm, k_pad // tk),          # reduction axis last
            in_specs=[
                pl.BlockSpec((tm, tk), lambda i, k: (i, k)),   # A row/K tile
                pl.BlockSpec((tk, N), lambda i, k: (k, 0)),    # B K tile
                pl.BlockSpec((1, N), lambda i, k: (0, 0)),     # bias
            ],
            out_specs=pl.BlockSpec((tm, N), lambda i, k: (i, 0)),
            scratch_shapes=[pltpu.VMEM((tm, N), jnp.float32)],
        ),
        compiler_params=pltpu.CompilerParams(
            dimension_semantics=("parallel", "arbitrary"),
            vmem_limit_bytes=48 * 1024 * 1024,
        ),
        cost_estimate=cost,
    )(a, b, bias2)
    return out[:M]


# -----------------------------------------------------------------------------
# Conv wrappers (im2col glue in plain JAX, matmul in Pallas)
# -----------------------------------------------------------------------------
def _im2col(xp_nhwc, kh, kw):
    n, hp, wp, c = xp_nhwc.shape
    ho, wo = hp - kh + 1, wp - kw + 1
    cols = [xp_nhwc[:, dy:dy + ho, dx:dx + wo, :]
            for dy in range(kh) for dx in range(kw)]
    patches = jnp.concatenate(cols, axis=-1).reshape(n * ho * wo, kh * kw * c)
    return patches, (n, ho, wo)


def conv2d_pallas(x_nhwc, w_oihw, bias, *, padding, apply_relu=False,
                  out_dtype=jnp.float32):
    """Stride-1 conv. w_oihw: (Cout, Cin, kh, kw) like nn.Conv2d.weight."""
    cout, cin, kh, kw = w_oihw.shape
    xp = jnp.pad(x_nhwc.astype(jnp.bfloat16),
                 ((0, 0), (padding, padding), (padding, padding), (0, 0)))
    patches, (n, ho, wo) = _im2col(xp, kh, kw)
    wmat = jnp.transpose(w_oihw, (2, 3, 1, 0)).reshape(kh * kw * cin, cout)
    y = matmul_bias(patches, wmat.astype(jnp.bfloat16), bias,
                    apply_relu=apply_relu, out_dtype=out_dtype)
    return y.reshape(n, ho, wo, cout)


# kernel-tap indices used by each output phase of ConvT(k=4, s=2, p=1)
_PHASE_TAPS = {0: (3, 1), 1: (2, 0)}


def conv_transpose2d_pallas(x_nhwc, w_iohw, bias, *, apply_relu=False,
                            out_dtype=jnp.float32):
    """ConvTranspose2d(k=4, s=2, p=1) via sub-pixel decomposition:
    four 2x2 stride-1 convs on the un-dilated input, outputs interleaved.
    w_iohw: (Cin, Cout, 4, 4) like nn.ConvTranspose2d.weight."""
    cin, cout, kh, kw = w_iohw.shape
    assert kh == 4 and kw == 4
    n, h, w_sp, _ = x_nhwc.shape
    xb = x_nhwc.astype(jnp.bfloat16)

    ys = []
    for r in (0, 1):
        row = []
        for cph in (0, 1):
            pad_r = (1, 0) if r == 0 else (0, 1)
            pad_c = (1, 0) if cph == 0 else (0, 1)
            xp = jnp.pad(xb, ((0, 0), pad_r, pad_c, (0, 0)))
            kr, kc = _PHASE_TAPS[r], _PHASE_TAPS[cph]
            # sub[dy, dx, ic, oc] = w[ic, oc, kr[dy], kc[dx]]
            sub = jnp.stack(
                [jnp.stack([w_iohw[:, :, kr[dy], kc[dx]] for dx in range(2)],
                           axis=0) for dy in range(2)], axis=0)
            wmat = sub.reshape(4 * cin, cout).astype(jnp.bfloat16)
            patches, (nn_, ho, wo) = _im2col(xp, 2, 2)
            y = matmul_bias(patches, wmat, bias, apply_relu=apply_relu,
                            out_dtype=out_dtype).reshape(nn_, ho, wo, cout)
            row.append(y)
        ys.append(row)

    # interleave: out[:, 2m+r, 2n+c, :] = ys[r][c][:, m, n, :]
    y = jnp.stack([jnp.stack(row, axis=0) for row in ys], axis=0)  # (2,2,N,H,W,C)
    y = jnp.transpose(y, (2, 3, 0, 4, 1, 5)).reshape(n, 2 * h, 2 * w_sp, cout)
    return y


# -----------------------------------------------------------------------------
# LightweightEncoder forward (Pallas) and a pure-XLA f32 reference
# -----------------------------------------------------------------------------
def lightweight_encoder_pallas(x_nchw, params):
    x = jnp.transpose(x_nchw, (0, 2, 3, 1))  # NCHW -> NHWC
    # layer 1: Conv2d 3x3 pad 1 + ReLU
    x = conv2d_pallas(x, params["w1"], params["b1"], padding=1,
                      apply_relu=True, out_dtype=jnp.bfloat16)
    # layer 2: ConvT 4x4 s2 p1 + ReLU
    x = conv_transpose2d_pallas(x, params["w2"], params["b2"],
                                apply_relu=True, out_dtype=jnp.bfloat16)
    # layers 3+4 fused: ConvT(h->h) followed by 1x1 conv(h->out), no ReLU in
    # between  ==  single ConvT with W3' = W3 . W4, b3' = W4 @ b3 + b4.
    w4mat = params["w4"][:, :, 0, 0]                         # (out, hidden)
    w3f = jnp.einsum("iokl,po->ipkl", params["w3"], w4mat)   # (hidden,out,4,4)
    b3f = w4mat @ params["b3"] + params["b4"]
    x = conv_transpose2d_pallas(x, w3f, b3f, apply_relu=False,
                                out_dtype=jnp.float32)
    return jnp.transpose(x, (0, 3, 1, 2))    # NHWC -> NCHW


def _conv_ref(x, w_oihw, b, padding):
    w_hwio = jnp.transpose(w_oihw, (2, 3, 1, 0))
    y = lax.conv_general_dilated(x, w_hwio, (1, 1), ((padding, padding),) * 2,
                                 dimension_numbers=("NHWC", "HWIO", "NHWC"))
    return y + b


def _convT_ref(x, w_iohw, b, stride, padding):
    w_conv = jnp.transpose(w_iohw[:, :, ::-1, ::-1], (1, 0, 2, 3))
    w_hwio = jnp.transpose(w_conv, (2, 3, 1, 0))
    pad = w_iohw.shape[2] - 1 - padding
    y = lax.conv_general_dilated(x, w_hwio, (1, 1), ((pad, pad),) * 2,
                                 lhs_dilation=(stride, stride),
                                 dimension_numbers=("NHWC", "HWIO", "NHWC"))
    return y + b


def lightweight_encoder_ref(x_nchw, params):
    x = jnp.transpose(x_nchw, (0, 2, 3, 1))
    x = jax.nn.relu(_conv_ref(x, params["w1"], params["b1"], 1))
    x = jax.nn.relu(_convT_ref(x, params["w2"], params["b2"], 2, 1))
    x = _convT_ref(x, params["w3"], params["b3"], 2, 1)
    x = _conv_ref(x, params["w4"], params["b4"], 0)
    return jnp.transpose(x, (0, 3, 1, 2))


def init_params(key, in_channels, hidden, out_channels):
    ks = jax.random.split(key, 8)

    def u(k, shape, fan_in):
        bound = 1.0 / jnp.sqrt(fan_in)
        return jax.random.uniform(k, shape, jnp.float32, -bound, bound)

    return {
        "w1": u(ks[0], (hidden, in_channels, 3, 3), in_channels * 9),
        "b1": u(ks[1], (hidden,), in_channels * 9),
        "w2": u(ks[2], (hidden, hidden, 4, 4), hidden * 16),
        "b2": u(ks[3], (hidden,), hidden * 16),
        "w3": u(ks[4], (hidden, hidden, 4, 4), hidden * 16),
        "b3": u(ks[5], (hidden,), hidden * 16),
        "w4": u(ks[6], (out_channels, hidden, 1, 1), hidden),
        "b4": u(ks[7], (out_channels,), hidden),
    }


if __name__ == "__main__":
    # Small, forward-consistent shapes (module defaults in=2048, hidden=512,
    # out=4 are scaled down for this synthetic test).
    batch, in_channels, hidden, out_channels, spatial = 2, 8, 32, 4, 8

    key = jax.random.PRNGKey(0)
    kx, kp = jax.random.split(key)
    x = jax.random.normal(kx, (batch, in_channels, spatial, spatial), jnp.float32)
    params = init_params(kp, in_channels, hidden, out_channels)

    fwd = jax.jit(lightweight_encoder_pallas)
    y = jax.block_until_ready(fwd(x, params))
    assert y.shape == (batch, out_channels, 4 * spatial, 4 * spatial), y.shape

    y_ref = jax.block_until_ready(jax.jit(lightweight_encoder_ref)(x, params))
    # bf16 operands with f32 accumulation -> slightly looser tolerance than f32
    assert jnp.allclose(y, y_ref, rtol=2e-2, atol=2e-2), \
        float(jnp.max(jnp.abs(y - y_ref)))

    print("KERNEL_OK")
</pallas_src>

<mosaic_0001>
module attributes {stable_mosaic.version = 11 : i64} {
  func.func @_matmul_bias_kernel(%arg0: i32, %arg1: i32, %arg2: memref<128x128xbf16, #tpu.memory_space<vmem>>, %arg3: memref<128x32xbf16, #tpu.memory_space<vmem>>, %arg4: memref<1x32xf32, #tpu.memory_space<vmem>>, %arg5: memref<128x32xbf16, #tpu.memory_space<vmem>>, %arg6: memref<128x32xf32, #tpu.memory_space<vmem>>) attributes {dimension_semantics = [#tpu.dimension_semantics<parallel>, #tpu.dimension_semantics<arbitrary>], iteration_bounds = array<i64: 1, 1>, scalar_prefetch = 0 : i64, scratch_operands = 1 : i64, tpu.core_type = #tpu.core_type<tc>, window_params = [{transform_indices = @transform_0, window_bounds = array<i64: 128, 128>}, {transform_indices = @transform_1, window_bounds = array<i64: 128, 32>}, {pipeline_mode = #tpu.pipeline_mode<synchronous>, transform_indices = @transform_2, window_bounds = array<i64: 1, 32>}, {transform_indices = @transform_3, window_bounds = array<i64: 128, 32>}]} {
    %c0_i32 = arith.constant 0 : i32
    %0 = arith.cmpi eq, %arg1, %c0_i32 : i32
    %1 = arith.extui %0 : i1 to i32
    %c0_i32_0 = arith.constant 0 : i32
    %2 = arith.cmpi ne, %1, %c0_i32_0 : i32
    scf.if %2 {
      %c0_10 = arith.constant 0 : index
      %c0_11 = arith.constant 0 : index
      %12 = vector.load %arg4[%c0_10, %c0_11] : memref<1x32xf32, #tpu.memory_space<vmem>>, vector<1x32xf32>
      %13 = vector.shape_cast %12 : vector<1x32xf32> to vector<1x32xf32>
      %14 = vector.broadcast %13 : vector<1x32xf32> to vector<128x32xf32>
      %c0_12 = arith.constant 0 : index
      %c0_13 = arith.constant 0 : index
      %15 = vector.load %arg6[%c0_12, %c0_13] : memref<128x32xf32, #tpu.memory_space<vmem>>, vector<128x32xf32>
      tpu.vector_store %arg6[%c0_12, %c0_13], %14 {strides = array<i32>} : memref<128x32xf32, #tpu.memory_space<vmem>>, vector<128x32xf32>,
    } else {
    }
    %c0 = arith.constant 0 : index
    %c0_1 = arith.constant 0 : index
    %3 = vector.load %arg6[%c0, %c0_1] : memref<128x32xf32, #tpu.memory_space<vmem>>, vector<128x32xf32>
    %c0_2 = arith.constant 0 : index
    %c0_3 = arith.constant 0 : index
    %4 = vector.load %arg2[%c0_2, %c0_3] : memref<128x128xbf16, #tpu.memory_space<vmem>>, vector<128x128xbf16>
    %c0_4 = arith.constant 0 : index
    %c0_5 = arith.constant 0 : index
    %5 = vector.load %arg3[%c0_4, %c0_5] : memref<128x32xbf16, #tpu.memory_space<vmem>>, vector<128x32xbf16>
    %cst = arith.constant dense<0.000000e+00> : vector<128x32xf32>
    %6 = tpu.matmul %4, %5, %cst {dimension_numbers = #tpu.dot_dimension_numbers<[1], [0], [0], [1], [0, 0, 1, 1], [], []>} : vector<128x128xbf16>, vector<128x32xbf16>, vector<128x32xf32> -> vector<128x32xf32>
    %7 = arith.addf %3, %6 : vector<128x32xf32>
    %c0_6 = arith.constant 0 : index
    %c0_7 = arith.constant 0 : index
    %8 = vector.load %arg6[%c0_6, %c0_7] : memref<128x32xf32, #tpu.memory_space<vmem>>, vector<128x32xf32>
    tpu.vector_store %arg6[%c0_6, %c0_7], %7 {strides = array<i32>} : memref<128x32xf32, #tpu.memory_space<vmem>>, vector<128x32xf32>,
    %c0_i32_8 = arith.constant 0 : i32
    %9 = arith.cmpi eq, %arg1, %c0_i32_8 : i32
    %10 = arith.extui %9 : i1 to i32
    %c0_i32_9 = arith.constant 0 : i32
    %11 = arith.cmpi ne, %10, %c0_i32_9 : i32
    scf.if %11 {
      %c0_10 = arith.constant 0 : index
      %c0_11 = arith.constant 0 : index
      %12 = vector.load %arg6[%c0_10, %c0_11] : memref<128x32xf32, #tpu.memory_space<vmem>>, vector<128x32xf32>
      %cst_12 = arith.constant 0.000000e+00 : f32
      %13 = vector.broadcast %cst_12 : f32 to vector<128x32xf32>
      %14 = arith.maximumf %12, %13 : vector<128x32xf32>
      %15 = arith.truncf %14 : vector<128x32xf32> to vector<128x32xbf16>
      %c0_13 = arith.constant 0 : index
      %c0_14 = arith.constant 0 : index
      %16 = vector.load %arg5[%c0_13, %c0_14] : memref<128x32xbf16, #tpu.memory_space<vmem>>, vector<128x32xbf16>
      tpu.vector_store %arg5[%c0_13, %c0_14], %15 {strides = array<i32>} : memref<128x32xbf16, #tpu.memory_space<vmem>>, vector<128x32xbf16>,
    } else {
    }
    return
  }
  func.func @transform_0(%arg0: i32, %arg1: i32) -> (i32, i32) {
    %c0_i32 = arith.constant 0 : i32
    return %arg0, %arg1 : i32, i32
  }
  func.func @transform_1(%arg0: i32, %arg1: i32) -> (i32, i32) {
    %c0_i32 = arith.constant 0 : i32
    %c0_i32_0 = arith.constant 0 : i32
    return %arg1, %c0_i32 : i32, i32
  }
  func.func @transform_2(%arg0: i32, %arg1: i32) -> (i32, i32) {
    %c0_i32 = arith.constant 0 : i32
    %c0_i32_0 = arith.constant 0 : i32
    %c0_i32_1 = arith.constant 0 : i32
    return %c0_i32, %c0_i32_0 : i32, i32
  }
  func.func @transform_3(%arg0: i32, %arg1: i32) -> (i32, i32) {
    %c0_i32 = arith.constant 0 : i32
    %c0_i32_0 = arith.constant 0 : i32
    return %arg0, %c0_i32 : i32, i32
  }
}

module attributes {stable_mosaic.version = 11 : i64} {
  func.func @_matmul_bias_kernel(%arg0: i32, %arg1: i32, %arg2: memref<256x128xbf16, #tpu.memory_space<vmem>>, %arg3: memref<128x4xbf16, #tpu.memory_space<vmem>>, %arg4: memref<1x4xf32, #tpu.memory_space<vmem>>, %arg5: memref<256x4xf32, #tpu.memory_space<vmem>>, %arg6: memref<256x4xf32, #tpu.memory_space<vmem>>) attributes {dimension_semantics = [#tpu.dimension_semantics<parallel>, #tpu.dimension_semantics<arbitrary>], iteration_bounds = array<i64: 2, 1>, scalar_prefetch = 0 : i64, scratch_operands = 1 : i64, tpu.core_type = #tpu.core_type<tc>, window_params = [{transform_indices = @transform_0, window_bounds = array<i64: 256, 128>}, {transform_indices = @transform_1, window_bounds = array<i64: 128, 4>}, {pipeline_mode = #tpu.pipeline_mode<synchronous>, transform_indices = @transform_2, window_bounds = array<i64: 1, 4>}, {transform_indices = @transform_3, window_bounds = array<i64: 256, 4>}]} {
    %c0_i32 = arith.constant 0 : i32
    %0 = arith.cmpi eq, %arg1, %c0_i32 : i32
    %1 = arith.extui %0 : i1 to i32
    %c0_i32_0 = arith.constant 0 : i32
    %2 = arith.cmpi ne, %1, %c0_i32_0 : i32
    scf.if %2 {
      %c0_10 = arith.constant 0 : index
      %c0_11 = arith.constant 0 : index
      %12 = vector.load %arg4[%c0_10, %c0_11] : memref<1x4xf32, #tpu.memory_space<vmem>>, vector<1x4xf32>
      %13 = vector.shape_cast %12 : vector<1x4xf32> to vector<1x4xf32>
      %14 = vector.broadcast %13 : vector<1x4xf32> to vector<256x4xf32>
      %c0_12 = arith.constant 0 : index
      %c0_13 = arith.constant 0 : index
      %15 = vector.load %arg6[%c0_12, %c0_13] : memref<256x4xf32, #tpu.memory_space<vmem>>, vector<256x4xf32>
      tpu.vector_store %arg6[%c0_12, %c0_13], %14 {strides = array<i32>} : memref<256x4xf32, #tpu.memory_space<vmem>>, vector<256x4xf32>,
    } else {
    }
    %c0 = arith.constant 0 : index
    %c0_1 = arith.constant 0 : index
    %3 = vector.load %arg6[%c0, %c0_1] : memref<256x4xf32, #tpu.memory_space<vmem>>, vector<256x4xf32>
    %c0_2 = arith.constant 0 : index
    %c0_3 = arith.constant 0 : index
    %4 = vector.load %arg2[%c0_2, %c0_3] : memref<256x128xbf16, #tpu.memory_space<vmem>>, vector<256x128xbf16>
    %c0_4 = arith.constant 0 : index
    %c0_5 = arith.constant 0 : index
    %5 = vector.load %arg3[%c0_4, %c0_5] : memref<128x4xbf16, #tpu.memory_space<vmem>>, vector<128x4xbf16>
    %cst = arith.constant dense<0.000000e+00> : vector<256x4xf32>
    %6 = tpu.matmul %4, %5, %cst {dimension_numbers = #tpu.dot_dimension_numbers<[1], [0], [0], [1], [0, 0, 1, 1], [], []>} : vector<256x128xbf16>, vector<128x4xbf16>, vector<256x4xf32> -> vector<256x4xf32>
    %7 = arith.addf %3, %6 : vector<256x4xf32>
    %c0_6 = arith.constant 0 : index
    %c0_7 = arith.constant 0 : index
    %8 = vector.load %arg6[%c0_6, %c0_7] : memref<256x4xf32, #tpu.memory_space<vmem>>, vector<256x4xf32>
    tpu.vector_store %arg6[%c0_6, %c0_7], %7 {strides = array<i32>} : memref<256x4xf32, #tpu.memory_space<vmem>>, vector<256x4xf32>,
    %c0_i32_8 = arith.constant 0 : i32
    %9 = arith.cmpi eq, %arg1, %c0_i32_8 : i32
    %10 = arith.extui %9 : i1 to i32
    %c0_i32_9 = arith.constant 0 : i32
    %11 = arith.cmpi ne, %10, %c0_i32_9 : i32
    scf.if %11 {
      %c0_10 = arith.constant 0 : index
      %c0_11 = arith.constant 0 : index
      %12 = vector.load %arg6[%c0_10, %c0_11] : memref<256x4xf32, #tpu.memory_space<vmem>>, vector<256x4xf32>
      %c0_12 = arith.constant 0 : index
      %c0_13 = arith.constant 0 : index
      %13 = vector.load %arg5[%c0_12, %c0_13] : memref<256x4xf32, #tpu.memory_space<vmem>>, vector<256x4xf32>
      tpu.vector_store %arg5[%c0_12, %c0_13], %12 {strides = array<i32>} : memref<256x4xf32, #tpu.memory_space<vmem>>, vector<256x4xf32>,
    } else {
    }
    return
  }
  func.func @transform_0(%arg0: i32, %arg1: i32) -> (i32, i32) {
    %c0_i32 = arith.constant 0 : i32
    return %arg0, %arg1 : i32, i32
  }
  func.func @transform_1(%arg0: i32, %arg1: i32) -> (i32, i32) {
    %c0_i32 = arith.constant 0 : i32
    %c0_i32_0 = arith.constant 0 : i32
    return %arg1, %c0_i32 : i32, i32
  }
  func.func @transform_2(%arg0: i32, %arg1: i32) -> (i32, i32) {
    %c0_i32 = arith.constant 0 : i32
    %c0_i32_0 = arith.constant 0 : i32
    %c0_i32_1 = arith.constant 0 : i32
    return %c0_i32, %c0_i32_0 : i32, i32
  }
  func.func @transform_3(%arg0: i32, %arg1: i32) -> (i32, i32) {
    %c0_i32 = arith.constant 0 : i32
    %c0_i32_0 = arith.constant 0 : i32
    return %arg0, %c0_i32 : i32, i32
  }
}

</mosaic_0001>

<bundles_post_ra>
// kernel: lightweight_encoder_pallas.9
= control target key start
LH: loop header
LB: loop body
LE: loop exit
PB: predicated region body
PF: predicated region fallthrough
CT: control target
= control target key end

     0   :  { %vm22_vm0 = vcmask 261120   ;;  %vm316_vm1 = vcmask 257024   ;;  %s609_s1 = inlined_call_operand.vmem [shape: bf16[128,32], index: 1, kind: input, shape index: {}]   ;;  %s610_s2 = inlined_call_operand.vmem [shape: f32[1,32], index: 2, kind: input, shape index: {}]   ;;  %s611_s0 = inlined_call_operand.vmem [shape: bf16[128,128], index: 0, kind: input, shape index: {}]   ;;  %s612_s3 = inlined_call_operand.vmem [shape: bf16[128,32], index: 3, kind: output, shape index: {}]  }
   0x1   :  { %v416_v0 = vld [vmem:[%s609_s1 + $0x38] sm:$0xff]  ;;  %v415_v1 = vld [vmem:[%s609_s1 + $0x30] sm:$0xff]  ;;  %v414_v2 = vld [vmem:[%s609_s1 + $0x28] sm:$0xff] }
   0x2   :  { %183 = vmatpush.bf16.msra.mxu0 %v416_v0  ;;  %417 = vmatpush.bf16.msra.mxu1 %v416_v0  ;;  %v413_v3 = vld [vmem:[%s609_s1 + $0x20] sm:$0xff]  ;;  %v412_v4 = vld [vmem:[%s609_s1 + $0x18] sm:$0xff]  ;;  %v411_v5 = vld [vmem:[%s609_s1 + $0x10] sm:$0xff] }
   0x3   :  { %418 = vmatpush.bf16.msra.mxu2 %v416_v0  ;;  %419 = vmatpush.bf16.msra.mxu3 %v416_v0  ;;  %v441_v6 = vld [vmem:[%s610_s2] ss:$0 sm:$0xff]  ;;  %v410_v7 = vld [vmem:[%s609_s1 + $0x8] sm:$0xff]  ;;  %v403_v10 = vld [vmem:[%s611_s0 + $0x10] sm:$0xff] }
   0x4   :  { %23 = vst.msk [vmem:[#allocation2] sm:$0xff] %vm22_vm0, %v441_v6  ;;  %v409_v8 = vld [vmem:[%s609_s1] sm:$0xff]  ;;  %v407_v12 = vld [vmem:[%s611_s0 + $0x30] sm:$0xff]  ;;  %v402_v13 = vld [vmem:[%s611_s0 + $0x8] sm:$0xff] }
   0x5   :  { %24 = vst.msk [vmem:[#allocation2 + $0x8] sm:$0xff] %vm22_vm0, %v441_v6  ;;  %v401_v9 = vld [vmem:[%s611_s0] sm:$0xff]  ;;  %v404_v14 = vld [vmem:[%s611_s0 + $0x18] sm:$0xff]  ;;  %v406_v15 = vld [vmem:[%s611_s0 + $0x28] sm:$0xff] }
   0x6   :  { %184 = vmatpush.bf16.msra.mxu0 %v415_v1  ;;  %420 = vmatpush.bf16.msra.mxu1 %v415_v1  ;;  %25 = vst.msk [vmem:[#allocation2 + $0x10] sm:$0xff] %vm22_vm0, %v441_v6  ;;  %v405_v11 = vld [vmem:[%s611_s0 + $0x20] sm:$0xff]  ;;  %v408_v16 = vld [vmem:[%s611_s0 + $0x38] sm:$0xff] }
   0x7   :  { %421 = vmatpush.bf16.msra.mxu2 %v415_v1  ;;  %422 = vmatpush.bf16.msra.mxu3 %v415_v1  ;;  %26 = vst.msk [vmem:[#allocation2 + $0x18] sm:$0xff] %vm22_vm0, %v441_v6 }
   0x8   :  { %27 = vst.msk [vmem:[#allocation2 + $0x20] sm:$0xff] %vm22_vm0, %v441_v6 }
   0x9   :  { %28 = vst.msk [vmem:[#allocation2 + $0x28] sm:$0xff] %vm22_vm0, %v441_v6 }
   0xa   :  { %185 = vmatpush.bf16.msra.mxu0 %v414_v2  ;;  %423 = vmatpush.bf16.msra.mxu1 %v414_v2  ;;  %29 = vst.msk [vmem:[#allocation2 + $0x30] sm:$0xff] %vm22_vm0, %v441_v6 }
   0xb   :  { %424 = vmatpush.bf16.msra.mxu2 %v414_v2  ;;  %425 = vmatpush.bf16.msra.mxu3 %v414_v2  ;;  %30 = vst.msk [vmem:[#allocation2 + $0x38] sm:$0xff] %vm22_vm0, %v441_v6  ;;  %v39_v17 = vld [vmem:[#allocation2] sm:$0xff] }
   0xc   :  { %31 = vst.msk [vmem:[#allocation2 + $0x40] sm:$0xff] %vm22_vm0, %v441_v6  ;;  %v40_v25 = vld [vmem:[#allocation2 + $0x8] sm:$0xff] }
   0xd   :  { %32 = vst.msk [vmem:[#allocation2 + $0x48] sm:$0xff] %vm22_vm0, %v441_v6  ;;  %v41_v43 = vld [vmem:[#allocation2 + $0x10] sm:$0xff] }
   0xe   :  { %186 = vmatpush.bf16.msra.mxu0 %v413_v3  ;;  %426 = vmatpush.bf16.msra.mxu1 %v413_v3  ;;  %33 = vst.msk [vmem:[#allocation2 + $0x50] sm:$0xff] %vm22_vm0, %v441_v6  ;;  %v42_v2 = vld [vmem:[#allocation2 + $0x18] sm:$0xff] }
   0xf   :  { %427 = vmatpush.bf16.msra.mxu2 %v413_v3  ;;  %428 = vmatpush.bf16.msra.mxu3 %v413_v3  ;;  %34 = vst.msk [vmem:[#allocation2 + $0x58] sm:$0xff] %vm22_vm0, %v441_v6  ;;  %v43_v18 = vld [vmem:[#allocation2 + $0x20] sm:$0xff] }
  0x10   :  { %35 = vst.msk [vmem:[#allocation2 + $0x60] sm:$0xff] %vm22_vm0, %v441_v6  ;;  %v44_v26 = vld [vmem:[#allocation2 + $0x28] sm:$0xff] }
  0x11   :  { %36 = vst.msk [vmem:[#allocation2 + $0x68] sm:$0xff] %vm22_vm0, %v441_v6  ;;  %v45_v44 = vld [vmem:[#allocation2 + $0x30] sm:$0xff] }
  0x12   :  { %187 = vmatpush.bf16.msra.mxu0 %v412_v4  ;;  %429 = vmatpush.bf16.msra.mxu1 %v412_v4  ;;  %37 = vst.msk [vmem:[#allocation2 + $0x70] sm:$0xff] %vm22_vm0, %v441_v6  ;;  %v46_v3 = vld [vmem:[#allocation2 + $0x38] sm:$0xff] }
  0x13   :  { %430 = vmatpush.bf16.msra.mxu2 %v412_v4  ;;  %431 = vmatpush.bf16.msra.mxu3 %v412_v4  ;;  %38 = vst.msk [vmem:[#allocation2 + $0x78] sm:$0xff] %vm22_vm0, %v441_v6  ;;  %v47_v23 = vld [vmem:[#allocation2 + $0x40] sm:$0xff] }
  0x14   :  { %v48_v40 = vld [vmem:[#allocation2 + $0x48] sm:$0xff] }
  0x15   :  { %v49_v63 = vld [vmem:[#allocation2 + $0x50] sm:$0xff] }
  0x16   :  { %188 = vmatpush.bf16.msra.mxu0 %v411_v5  ;;  %432 = vmatpush.bf16.msra.mxu1 %v411_v5 }
  0x17   :  { %433 = vmatpush.bf16.msra.mxu2 %v411_v5  ;;  %434 = vmatpush.bf16.msra.mxu3 %v411_v5  ;;  %v51_v24 = vld [vmem:[#allocation2 + $0x60] sm:$0xff] }
  0x18   :  { %v52_v41 = vld [vmem:[#allocation2 + $0x68] sm:$0xff] }
  0x19   :  { %v53_v0 = vld [vmem:[#allocation2 + $0x70] sm:$0xff] }
  0x1a   :  { %189 = vmatpush.bf16.msra.mxu0 %v410_v7  ;;  %435 = vmatpush.bf16.msra.mxu1 %v410_v7 }
  0x1b   :  { %436 = vmatpush.bf16.msra.mxu2 %v410_v7  ;;  %437 = vmatpush.bf16.msra.mxu3 %v410_v7 }
  0x1e   :  { %190 = vmatpush.bf16.msra.mxu0 %v409_v8  ;;  %438 = vmatpush.bf16.msra.mxu1 %v409_v8 }
  0x1f   :  { %439 = vmatpush.bf16.msra.mxu2 %v409_v8  ;;  %440 = vmatpush.bf16.msra.mxu3 %v409_v8 }
  0x21   :  { %191 = vmatmul.bf16.vlgmr.msra.gmra.mxu0 %v401_v9  ;;  %201 = vmatmul.bf16.vlgmr.msra.gmra.mxu1 %v403_v10 }
  0x22   :  { %211 = vmatmul.bf16.vlgmr.msra.gmra.mxu2 %v405_v11  ;;  %221 = vmatmul.bf16.vlgmr.msra.gmra.mxu3 %v407_v12 }
  0x31   :  { %196 = vmatmul.bf16.gmra.mxu0 %v402_v13  ;;  %206 = vmatmul.bf16.gmra.mxu1 %v404_v14 }
  0x32   :  { %216 = vmatmul.bf16.gmra.mxu2 %v406_v15  ;;  %226 = vmatmul.bf16.gmra.mxu3 %v408_v16 }
  0x9e   :  { %v192_v19 = vpop.f32.mrf.mxu0  ;;  %v202_v20 = vpop.f32.mrf.mxu1 }
  0x9f   :  { %v232_v21 = vadd.f32 %v192_v19, %v39_v17  ;;  %v236_v22 = vadd.f32 %v202_v20, %v43_v18 }
  0xa1   :  { %249 = vst.msk [vmem:[#allocation2] sm:$0xff] %vm22_vm0, %v232_v21 }
  0xa2   :  { %253 = vst.msk [vmem:[#allocation2 + $0x20] sm:$0xff] %vm22_vm0, %v236_v22 }
  0xa5   :  { %v212_v27 = vpop.f32.mrf.mxu2  ;;  %v222_v28 = vpop.f32.mrf.mxu3 }
  0xa6   :  { %v240_v29 = vadd.f32 %v212_v27, %v47_v23  ;;  %v244_v30 = vadd.f32 %v222_v28, %v51_v24  ;;  %v194_v31 = vpop.f32.mrf.mxu0  ;;  %v204_v32 = vpop.f32.mrf.mxu1  ;;  %v50_v23 = vld [vmem:[#allocation2 + $0x58] sm:$0xff] }
  0xa7   :  { %v233_v33 = vadd.f32 %v194_v31, %v40_v25  ;;  %v237_v34 = vadd.f32 %v204_v32, %v44_v26  ;;  %v54_v24 = vld [vmem:[#allocation2 + $0x78] sm:$0xff] }
  0xa8   :  { %v268_v35 = vld [vmem:[#allocation2] sm:$0xff]  ;;  %257 = vst.msk [vmem:[#allocation2 + $0x40] sm:$0xff] %vm22_vm0, %v240_v29 }
  0xa9   :  { %v284_v36 = vmax.f32 %v268_v35, 0.0  ;;  %v272_v37 = vld [vmem:[#allocation2 + $0x20] sm:$0xff]  ;;  %261 = vst.msk [vmem:[#allocation2 + $0x60] sm:$0xff] %vm22_vm0, %v244_v30 }
  0xaa   :  { %v288_v38 = vmax.f32 %v272_v37, 0.0  ;;  %250 = vst.msk [vmem:[#allocation2 + $0x8] sm:$0xff] %vm22_vm0, %v233_v33 }
  0xab   :  { %v300_v39 = vpack.c.bf16 %v284_v36, %v284_v36  ;;  %254 = vst.msk [vmem:[#allocation2 + $0x28] sm:$0xff] %vm22_vm0, %v237_v34 }
  0xac   :  { %v304_v42 = vpack.c.bf16 %v288_v38, %v288_v38 }
  0xad   :  { %317 = vst.msk [vmem:[%s612_s3] sm:$0xf] %vm316_vm1, %v300_v39  ;;  %v214_v45 = vpop.f32.mrf.mxu2  ;;  %v224_v46 = vpop.f32.mrf.mxu3 }
  0xae   :  { %321 = vst.msk [vmem:[%s612_s3 + $0x10] sm:$0xf] %vm316_vm1, %v304_v42  ;;  %v241_v47 = vadd.f32 %v214_v45, %v48_v40  ;;  %v245_v48 = vadd.f32 %v224_v46, %v52_v41  ;;  %v197_v49 = vpop.f32.mrf.mxu0  ;;  %v207_v50 = vpop.f32.mrf.mxu1 }
  0xaf   :  { %v276_v51 = vld [vmem:[#allocation2 + $0x40] sm:$0xff]  ;;  %v234_v52 = vadd.f32 %v197_v49, %v41_v43  ;;  %v238_v53 = vadd.f32 %v207_v50, %v45_v44 }
  0xb0   :  { %v292_v54 = vmax.f32 %v276_v51, 0.0  ;;  %v280_v55 = vld [vmem:[#allocation2 + $0x60] sm:$0xff]  ;;  %258 = vst.msk [vmem:[#allocation2 + $0x48] sm:$0xff] %vm22_vm0, %v241_v47 }
  0xb1   :  { %v296_v56 = vmax.f32 %v280_v55, 0.0  ;;  %v269_v57 = vld [vmem:[#allocation2 + $0x8] sm:$0xff]  ;;  %262 = vst.msk [vmem:[#allocation2 + $0x68] sm:$0xff] %vm22_vm0, %v245_v48 }
  0xb2   :  { %v308_v58 = vpack.c.bf16 %v292_v54, %v292_v54  ;;  %v285_v59 = vmax.f32 %v269_v57, 0.0  ;;  %v273_v60 = vld [vmem:[#allocation2 + $0x28] sm:$0xff]  ;;  %251 = vst.msk [vmem:[#allocation2 + $0x10] sm:$0xff] %vm22_vm0, %v234_v52 }
  0xb3   :  { %v312_v61 = vpack.c.bf16 %v296_v56, %v296_v56  ;;  %v289_v62 = vmax.f32 %v273_v60, 0.0  ;;  %255 = vst.msk [vmem:[#allocation2 + $0x30] sm:$0xff] %vm22_vm0, %v238_v53 }
  0xb4   :  { %325 = vst.msk [vmem:[%s612_s3 + $0x20] sm:$0xf] %vm316_vm1, %v308_v58  ;;  %v301_v1 = vpack.c.bf16 %v285_v59, %v285_v59 }
  0xb5   :  { %329 = vst.msk [vmem:[%s612_s3 + $0x30] sm:$0xf] %vm316_vm1, %v312_v61  ;;  %v305_v4 = vpack.c.bf16 %v289_v62, %v289_v62  ;;  %v217_v5 = vpop.f32.mrf.mxu2  ;;  %v227_v6 = vpop.f32.mrf.mxu3 }
  0xb6   :  { %318 = vst.msk [vmem:[%s612_s3 + $0x4] sm:$0xf] %vm316_vm1, %v301_v1  ;;  %v242_v7 = vadd.f32 %v217_v5, %v49_v63  ;;  %v246_v8 = vadd.f32 %v227_v6, %v53_v0  ;;  %v199_v9 = vpop.f32.mrf.mxu0  ;;  %v209_v10 = vpop.f32.mrf.mxu1 }
  0xb7   :  { %322 = vst.msk [vmem:[%s612_s3 + $0x14] sm:$0xf] %vm316_vm1, %v305_v4  ;;  %v277_v11 = vld [vmem:[#allocation2 + $0x48] sm:$0xff]  ;;  %v235_v12 = vadd.f32 %v199_v9, %v42_v2  ;;  %v239_v13 = vadd.f32 %v209_v10, %v46_v3 }
  0xb8   :  { %v293_v14 = vmax.f32 %v277_v11, 0.0  ;;  %v281_v15 = vld [vmem:[#allocation2 + $0x68] sm:$0xff]  ;;  %259 = vst.msk [vmem:[#allocation2 + $0x50] sm:$0xff] %vm22_vm0, %v242_v7 }
  0xb9   :  { %v297_v16 = vmax.f32 %v281_v15, 0.0  ;;  %v270_v17 = vld [vmem:[#allocation2 + $0x10] sm:$0xff]  ;;  %263 = vst.msk [vmem:[#allocation2 + $0x70] sm:$0xff] %vm22_vm0, %v246_v8 }
  0xba   :  { %v309_v18 = vpack.c.bf16 %v293_v14, %v293_v14  ;;  %v286_v19 = vmax.f32 %v270_v17, 0.0  ;;  %v274_v20 = vld [vmem:[#allocation2 + $0x30] sm:$0xff]  ;;  %252 = vst.msk [vmem:[#allocation2 + $0x18] sm:$0xff] %vm22_vm0, %v235_v12 }
  0xbb   :  { %v313_v21 = vpack.c.bf16 %v297_v16, %v297_v16  ;;  %v290_v22 = vmax.f32 %v274_v20, 0.0  ;;  %256 = vst.msk [vmem:[#allocation2 + $0x38] sm:$0xff] %vm22_vm0, %v239_v13 }
  0xbc   :  { %326 = vst.msk [vmem:[%s612_s3 + $0x24] sm:$0xf] %vm316_vm1, %v309_v18  ;;  %v302_v25 = vpack.c.bf16 %v286_v19, %v286_v19 }
  0xbd   :  { %330 = vst.msk [vmem:[%s612_s3 + $0x34] sm:$0xf] %vm316_vm1, %v313_v21  ;;  %v306_v26 = vpack.c.bf16 %v290_v22, %v290_v22  ;;  %v219_v27 = vpop.f32.mrf.mxu2  ;;  %v229_v28 = vpop.f32.mrf.mxu3 }
  0xbe   :  { %319 = vst.msk [vmem:[%s612_s3 + $0x8] sm:$0xf] %vm316_vm1, %v302_v25  ;;  %v243_v29 = vadd.f32 %v219_v27, %v50_v23  ;;  %v247_v30 = vadd.f32 %v229_v28, %v54_v24 }
  0xbf   :  { %323 = vst.msk [vmem:[%s612_s3 + $0x18] sm:$0xf] %vm316_vm1, %v306_v26  ;;  %v278_v31 = vld [vmem:[#allocation2 + $0x50] sm:$0xff] }
  0xc0   :  { %v294_v32 = vmax.f32 %v278_v31, 0.0  ;;  %v282_v33 = vld [vmem:[#allocation2 + $0x70] sm:$0xff]  ;;  %260 = vst.msk [vmem:[#allocation2 + $0x58] sm:$0xff] %vm22_vm0, %v243_v29 }
  0xc1   :  { %v298_v34 = vmax.f32 %v282_v33, 0.0  ;;  %v271_v35 = vld [vmem:[#allocation2 + $0x18] sm:$0xff]  ;;  %264 = vst.msk [vmem:[#allocation2 + $0x78] sm:$0xff] %vm22_vm0, %v247_v30 }
  0xc2   :  { %v310_v36 = vpack.c.bf16 %v294_v32, %v294_v32  ;;  %v287_v37 = vmax.f32 %v271_v35, 0.0  ;;  %v275_v38 = vld [vmem:[#allocation2 + $0x38] sm:$0xff] }
  0xc3   :  { %v314_v39 = vpack.c.bf16 %v298_v34, %v298_v34  ;;  %v291_v40 = vmax.f32 %v275_v38, 0.0 }
  0xc4   :  { %327 = vst.msk [vmem:[%s612_s3 + $0x28] sm:$0xf] %vm316_vm1, %v310_v36  ;;  %v303_v41 = vpack.c.bf16 %v287_v37, %v287_v37 }
  0xc5   :  { %331 = vst.msk [vmem:[%s612_s3 + $0x38] sm:$0xf] %vm316_vm1, %v314_v39  ;;  %v307_v42 = vpack.c.bf16 %v291_v40, %v291_v40 }
  0xc6   :  { %320 = vst.msk [vmem:[%s612_s3 + $0xc] sm:$0xf] %vm316_vm1, %v303_v41 }
  0xc7   :  { %324 = vst.msk [vmem:[%s612_s3 + $0x1c] sm:$0xf] %vm316_vm1, %v307_v42  ;;  %v279_v43 = vld [vmem:[#allocation2 + $0x58] sm:$0xff] }
  0xc8   :  { %v295_v44 = vmax.f32 %v279_v43, 0.0  ;;  %v283_v45 = vld [vmem:[#allocation2 + $0x78] sm:$0xff] }
  0xc9   :  { %v299_v46 = vmax.f32 %v283_v45, 0.0 }
  0xca   :  { %v311_v47 = vpack.c.bf16 %v295_v44, %v295_v44 }
  0xcb   :  { %v315_v48 = vpack.c.bf16 %v299_v46, %v299_v46 }
  0xcc   :  { %328 = vst.msk [vmem:[%s612_s3 + $0x2c] sm:$0xf] %vm316_vm1, %v311_v47 }
  0xcd   :  { %332 = vst.msk [vmem:[%s612_s3 + $0x3c] sm:$0xf] %vm316_vm1, %v315_v48 }

// kernel: lightweight_encoder_pallas.14
= control target key start
LH: loop header
LB: loop body
LE: loop exit
PB: predicated region body
PF: predicated region fallthrough
CT: control target
= control target key end

     0   :  { %s1013_s12 = smov 0   ;;  %s1015_s13 = smov 0   ;;  %s1228_s0 = inlined_call_operand.vmem [shape: bf16[512,128], index: 0, kind: input, shape index: {}]   ;;  %s1229_s1 = inlined_call_operand.vmem [shape: bf16[128,4], index: 1, kind: input, shape index: {}]   ;;  %s1230_s2 = inlined_call_operand.vmem [shape: f32[1,4], index: 2, kind: input, shape index: {}]   ;;  %s1231_s3 = inlined_call_operand.vmem [shape: f32[512,4], index: 3, kind: output, shape index: {}]  }
   0x1   :  { %s1017_s14 = smov 0  }
   0x2 LB: > { %s25_s15 = sadd.s32 1, %s987_s13  ;;  %p793_p0 = scmp.ge.s32.totalorder %s991_s14, 1  ;;  %s991_s14 = sphi %s1017_s14, %s13_s14   ;;  %s987_s13 = sphi %s1015_s13, %s1233_s13   ;;  %s983_s12 = sphi %s1013_s12, %s1232_s12  }
   0x3   : > { %p27_p1 = scmp.ge.s32.totalorder %s25_s15, 2  ;;  %p166_p2 = scmp.lt.s32.totalorder %s991_s14, 3 }
   0x5   : > { %s1235_s15 = smov (%p27_p1, %s25_s15), 0  ;;  %p167_p3 = pnand %p793_p0, %p166_p2 }
   0x6   : > { %s794_s24 = sshll.u32 (!%p167_p3), %s983_s12, 5 }
   0x7   : > { %170 = sbr.rel (%p167_p3) target bundleno = 246 (0xf6), region = 32  ;;  %p199_p4 = scmp.lt.s32.totalorder (!%p167_p3), %s794_s24, 63 }
   0xc   : > { %v919_v0 = vld [vmem:[%s1229_s1 + $0x38] sm:$0xff]  ;;  %v918_v1 = vld [vmem:[%s1229_s1 + $0x30] sm:$0xff]  ;;  %v917_v2 = vld [vmem:[%s1229_s1 + $0x28] sm:$0xff]  ;;  %s1237_s24 = smov (!%p199_p4, %s794_s24), 63  ;;  %vm227_vm0 = vcmask 31744  }
   0xd   : > { %484 = vmatpush.bf16.msra.mxu0 %v919_v0  ;;  %920 = vmatpush.bf16.msra.mxu1 %v919_v0  ;;  %v916_v3 = vld [vmem:[%s1229_s1 + $0x20] sm:$0xff]  ;;  %v915_v4 = vld [vmem:[%s1229_s1 + $0x18] sm:$0xff]  ;;  %v914_v5 = vld [vmem:[%s1229_s1 + $0x10] sm:$0xff]  ;;  %s795_s4 = sshll.u32 %s1237_s24, 2  ;;  %s797_s12 = sshll.u32 %s1237_s24, 3 }
   0xe   : > { %921 = vmatpush.bf16.msra.mxu2 %v919_v0  ;;  %922 = vmatpush.bf16.msra.mxu3 %v919_v0  ;;  %v913_v6 = vld [vmem:[%s1229_s1 + $0x8] sm:$0xff]  ;;  %v912_v7 = vld [vmem:[%s1229_s1] sm:$0xff]  ;;  %s1064_s9 = scalar_lea.vmem %s1228_s0, %s795_s4  ;;  %s1123_s18 = scalar_lea.vmem %s1231_s3, %s797_s12 }
   0xf   : > { %v896_v8 = vld [vmem:[%s1064_s9] sm:$0xff]  ;;  %v897_v12 = vld [vmem:[%s1064_s9 + $0x8] sm:$0xff]  ;;  %v898_v17 = vld [vmem:[%s1064_s9 + $0x10] sm:$0xff] }
  0x10   : > { %v900_v9 = vld [vmem:[%s1064_s9 + $0x20] sm:$0xff]  ;;  %v901_v13 = vld [vmem:[%s1064_s9 + $0x28] sm:$0xff]  ;;  %v902_v18 = vld [vmem:[%s1064_s9 + $0x30] sm:$0xff] }
  0x11   : > { %485 = vmatpush.bf16.msra.mxu0 %v918_v1  ;;  %923 = vmatpush.bf16.msra.mxu1 %v918_v1  ;;  %v904_v10 = vld [vmem:[%s1064_s9 + $0x40] sm:$0xff]  ;;  %v905_v14 = vld [vmem:[%s1064_s9 + $0x48] sm:$0xff]  ;;  %v906_v19 = vld [vmem:[%s1064_s9 + $0x50] sm:$0xff] }
  0x12   : > { %924 = vmatpush.bf16.msra.mxu2 %v918_v1  ;;  %925 = vmatpush.bf16.msra.mxu3 %v918_v1  ;;  %v908_v11 = vld [vmem:[%s1064_s9 + $0x60] sm:$0xff]  ;;  %v909_v15 = vld [vmem:[%s1064_s9 + $0x68] sm:$0xff]  ;;  %v910_v20 = vld [vmem:[%s1064_s9 + $0x70] sm:$0xff] }
  0x13   : > { %v968_v16 = vld [vmem:[%s1230_s2] ss:$0 sm:$0xff]  ;;  %v899_v21 = vld [vmem:[%s1064_s9 + $0x18] sm:$0xff] }
  0x14   : > { %228 = vst.msk [vmem:[#allocation2] sm:$0xff] %vm227_vm0, %v968_v16  ;;  %v903_v22 = vld [vmem:[%s1064_s9 + $0x38] sm:$0xff] }
  0x15   : > { %486 = vmatpush.bf16.msra.mxu0 %v917_v2  ;;  %926 = vmatpush.bf16.msra.mxu1 %v917_v2  ;;  %229 = vst.msk [vmem:[#allocation2 + $0x8] sm:$0xff] %vm227_vm0, %v968_v16  ;;  %v907_v23 = vld [vmem:[%s1064_s9 + $0x58] sm:$0xff] }
  0x16   : > { %927 = vmatpush.bf16.msra.mxu2 %v917_v2  ;;  %928 = vmatpush.bf16.msra.mxu3 %v917_v2  ;;  %230 = vst.msk [vmem:[#allocation2 + $0x10] sm:$0xff] %vm227_vm0, %v968_v16  ;;  %v911_v24 = vld [vmem:[%s1064_s9 + $0x78] sm:$0xff] }
  0x17   : > { %231 = vst.msk [vmem:[#allocation2 + $0x18] sm:$0xff] %vm227_vm0, %v968_v16 }
  0x18   : > { %232 = vst.msk [vmem:[#allocation2 + $0x20] sm:$0xff] %vm227_vm0, %v968_v16 }
  0x19   : > { %487 = vmatpush.bf16.msra.mxu0 %v916_v3  ;;  %929 = vmatpush.bf16.msra.mxu1 %v916_v3  ;;  %233 = vst.msk [vmem:[#allocation2 + $0x28] sm:$0xff] %vm227_vm0, %v968_v16 }
  0x1a   : > { %930 = vmatpush.bf16.msra.mxu2 %v916_v3  ;;  %931 = vmatpush.bf16.msra.mxu3 %v916_v3  ;;  %234 = vst.msk [vmem:[#allocation2 + $0x30] sm:$0xff] %vm227_vm0, %v968_v16 }
  0x1b   : > { %235 = vst.msk [vmem:[#allocation2 + $0x38] sm:$0xff] %vm227_vm0, %v968_v16  ;;  %v260_v25 = vld [vmem:[#allocation2] sm:$0xff] }
  0x1c   : > { %236 = vst.msk [vmem:[#allocation2 + $0x40] sm:$0xff] %vm227_vm0, %v968_v16  ;;  %v261_v35 = vld [vmem:[#allocation2 + $0x8] sm:$0xff] }
  0x1d   : > { %488 = vmatpush.bf16.msra.mxu0 %v915_v4  ;;  %932 = vmatpush.bf16.msra.mxu1 %v915_v4  ;;  %237 = vst.msk [vmem:[#allocation2 + $0x48] sm:$0xff] %vm227_vm0, %v968_v16  ;;  %v262_v54 = vld [vmem:[#allocation2 + $0x10] sm:$0xff] }
  0x1e   : > { %933 = vmatpush.bf16.msra.mxu2 %v915_v4  ;;  %934 = vmatpush.bf16.msra.mxu3 %v915_v4  ;;  %238 = vst.msk [vmem:[#allocation2 + $0x50] sm:$0xff] %vm227_vm0, %v968_v16  ;;  %v263_v1 = vld [vmem:[#allocation2 + $0x18] sm:$0xff] }
  0x1f   : > { %239 = vst.msk [vmem:[#allocation2 + $0x58] sm:$0xff] %vm227_vm0, %v968_v16 }
  0x20   : > { %240 = vst.msk [vmem:[#allocation2 + $0x60] sm:$0xff] %vm227_vm0, %v968_v16 }
  0x21   : > { %489 = vmatpush.bf16.msra.mxu0 %v914_v5  ;;  %935 = vmatpush.bf16.msra.mxu1 %v914_v5  ;;  %241 = vst.msk [vmem:[#allocation2 + $0x68] sm:$0xff] %vm227_vm0, %v968_v16 }
  0x22   : > { %936 = vmatpush.bf16.msra.mxu2 %v914_v5  ;;  %937 = vmatpush.bf16.msra.mxu3 %v914_v5  ;;  %242 = vst.msk [vmem:[#allocation2 + $0x70] sm:$0xff] %vm227_vm0, %v968_v16 }
  0x23   : > { %243 = vst.msk [vmem:[#allocation2 + $0x78] sm:$0xff] %vm227_vm0, %v968_v16  ;;  %v268_v26 = vld [vmem:[#allocation2 + $0x40] sm:$0xff] }
  0x24   : > { %244 = vst.msk [vmem:[#allocation2 + $0x80] sm:$0xff] %vm227_vm0, %v968_v16  ;;  %v269_v38 = vld [vmem:[#allocation2 + $0x48] sm:$0xff] }
  0x25   : > { %490 = vmatpush.bf16.msra.mxu0 %v913_v6  ;;  %938 = vmatpush.bf16.msra.mxu1 %v913_v6  ;;  %245 = vst.msk [vmem:[#allocation2 + $0x88] sm:$0xff] %vm227_vm0, %v968_v16  ;;  %v270_v55 = vld [vmem:[#allocation2 + $0x50] sm:$0xff] }
  0x26   : > { %939 = vmatpush.bf16.msra.mxu2 %v913_v6  ;;  %940 = vmatpush.bf16.msra.mxu3 %v913_v6  ;;  %246 = vst.msk [vmem:[#allocation2 + $0x90] sm:$0xff] %vm227_vm0, %v968_v16  ;;  %v271_v4 = vld [vmem:[#allocation2 + $0x58] sm:$0xff] }
  0x27   : > { %247 = vst.msk [vmem:[#allocation2 + $0x98] sm:$0xff] %vm227_vm0, %v968_v16 }
  0x28   : > { %248 = vst.msk [vmem:[#allocation2 + $0xa0] sm:$0xff] %vm227_vm0, %v968_v16 }
  0x29   : > { %491 = vmatpush.bf16.msra.mxu0 %v912_v7  ;;  %941 = vmatpush.bf16.msra.mxu1 %v912_v7  ;;  %249 = vst.msk [vmem:[#allocation2 + $0xa8] sm:$0xff] %vm227_vm0, %v968_v16 }
  0x2a   : > { %942 = vmatpush.bf16.msra.mxu2 %v912_v7  ;;  %943 = vmatpush.bf16.msra.mxu3 %v912_v7  ;;  %250 = vst.msk [vmem:[#allocation2 + $0xb0] sm:$0xff] %vm227_vm0, %v968_v16 }
  0x2b   : > { %251 = vst.msk [vmem:[#allocation2 + $0xb8] sm:$0xff] %vm227_vm0, %v968_v16  ;;  %v276_v31 = vld [vmem:[#allocation2 + $0x80] sm:$0xff] }
  0x2c   : > { %492 = vmatmul.bf16.vlgmr.msra.gmra.mxu0 %v896_v8  ;;  %512 = vmatmul.bf16.vlgmr.msra.gmra.mxu1 %v900_v9  ;;  %252 = vst.msk [vmem:[#allocation2 + $0xc0] sm:$0xff] %vm227_vm0, %v968_v16  ;;  %v277_v45 = vld [vmem:[#allocation2 + $0x88] sm:$0xff] }
  0x2d   : > { %532 = vmatmul.bf16.vlgmr.msra.gmra.mxu2 %v904_v10  ;;  %552 = vmatmul.bf16.vlgmr.msra.gmra.mxu3 %v908_v11  ;;  %253 = vst.msk [vmem:[#allocation2 + $0xc8] sm:$0xff] %vm227_vm0, %v968_v16  ;;  %v278_v60 = vld [vmem:[#allocation2 + $0x90] sm:$0xff] }
  0x2e   : > { %254 = vst.msk [vmem:[#allocation2 + $0xd0] sm:$0xff] %vm227_vm0, %v968_v16  ;;  %v279_v11 = vld [vmem:[#allocation2 + $0x98] sm:$0xff] }
  0x2f   : > { %255 = vst.msk [vmem:[#allocation2 + $0xd8] sm:$0xff] %vm227_vm0, %v968_v16 }
  0x30   : > { %256 = vst.msk [vmem:[#allocation2 + $0xe0] sm:$0xff] %vm227_vm0, %v968_v16 }
  0x31   : > { %257 = vst.msk [vmem:[#allocation2 + $0xe8] sm:$0xff] %vm227_vm0, %v968_v16 }
  0x32   : > { %258 = vst.msk [vmem:[#allocation2 + $0xf0] sm:$0xff] %vm227_vm0, %v968_v16 }
  0x33   : > { %259 = vst.msk [vmem:[#allocation2 + $0xf8] sm:$0xff] %vm227_vm0, %v968_v16  ;;  %v284_v32 = vld [vmem:[#allocation2 + $0xc0] sm:$0xff] }
  0x34   : > { %v285_v46 = vld [vmem:[#allocation2 + $0xc8] sm:$0xff] }
  0x35   : > { %v286_v62 = vld [vmem:[#allocation2 + $0xd0] sm:$0xff] }
  0x3c   : > { %497 = vmatmul.bf16.gmra.mxu0 %v897_v12  ;;  %517 = vmatmul.bf16.gmra.mxu1 %v901_v13  ;;  %v287_v12 = vld [vmem:[#allocation2 + $0xd8] sm:$0xff] }
  0x3d   : > { %537 = vmatmul.bf16.gmra.mxu2 %v905_v14  ;;  %557 = vmatmul.bf16.gmra.mxu3 %v909_v15 }
  0x4c   : > { %502 = vmatmul.bf16.gmra.mxu0 %v898_v17  ;;  %522 = vmatmul.bf16.gmra.mxu1 %v902_v18 }
  0x4d   : > { %542 = vmatmul.bf16.gmra.mxu2 %v906_v19  ;;  %562 = vmatmul.bf16.gmra.mxu3 %v910_v20 }
  0x5c   : > { %507 = vmatmul.bf16.gmra.mxu0 %v899_v21  ;;  %527 = vmatmul.bf16.gmra.mxu1 %v903_v22  ;;  %v264_v22 = vld [vmem:[#allocation2 + $0x20] sm:$0xff] }
  0x5d   : > { %547 = vmatmul.bf16.gmra.mxu2 %v907_v23  ;;  %567 = vmatmul.bf16.gmra.mxu3 %v911_v24  ;;  %v272_v23 = vld [vmem:[#allocation2 + $0x60] sm:$0xff] }
  0xa9   : > { %v493_v27 = vpop.f32.mrf.mxu0  ;;  %v513_v28 = vpop.f32.mrf.mxu1 }
  0xaa   : > { %v573_v29 = vadd.f32 %v493_v27, %v260_v25  ;;  %v581_v30 = vadd.f32 %v513_v28, %v268_v26  ;;  %v280_v28 = vld [vmem:[#allocation2 + $0xa0] sm:$0xff] }
  0xac   : > { %606 = vst.msk [vmem:[#allocation2] sm:$0xff] %vm227_vm0, %v573_v29 }
  0xad   : > { %614 = vst.msk [vmem:[#allocation2 + $0x40] sm:$0xff] %vm227_vm0, %v581_v30  ;;  %v288_v30 = vld [vmem:[#allocation2 + $0xe0] sm:$0xff] }
  0xb0   : > { %v533_v33 = vpop.f32.mrf.mxu2  ;;  %v553_v34 = vpop.f32.mrf.mxu3 }
  0xb1   : > { %v589_v36 = vadd.f32 %v533_v33, %v276_v31  ;;  %v495_v37 = vpop.f32.mrf.mxu0  ;;  %v515_v39 = vpop.f32.mrf.mxu1  ;;  %v597_v40 = vadd.f32 %v553_v34, %v284_v32  ;;  %v265_v33 = vld [vmem:[#allocation2 + $0x28] sm:$0xff] }
  0xb2   : > { %v574_v42 = vadd.f32 %v495_v37, %v261_v35  ;;  %v582_v44 = vadd.f32 %v515_v39, %v269_v38 }
  0xb3   : > { %v641_v41 = vld [vmem:[#allocation2] sm:$0xff]  ;;  %622 = vst.msk [vmem:[#allocation2 + $0x80] sm:$0xff] %vm227_vm0, %v589_v36  ;;  %v273_v36 = vld [vmem:[#allocation2 + $0x68] sm:$0xff] }
  0xb4   : > { %673 = vst.msk [vmem:[%s1123_s18] sm:$0xff] %vm227_vm0, %v641_v41  ;;  %v649_v43 = vld [vmem:[#allocation2 + $0x40] sm:$0xff] }
  0xb5   : > { %681 = vst.msk [vmem:[%s1123_s18 + $0x40] sm:$0xff] %vm227_vm0, %v649_v43  ;;  %v281_v43 = vld [vmem:[#allocation2 + $0xa8] sm:$0xff] }
  0xb6   : > { %630 = vst.msk [vmem:[#allocation2 + $0xc0] sm:$0xff] %vm227_vm0, %v597_v40 }
  0xb7   : > { %607 = vst.msk [vmem:[#allocation2 + $0x8] sm:$0xff] %vm227_vm0, %v574_v42 }
  0xb8   : > { %615 = vst.msk [vmem:[#allocation2 + $0x48] sm:$0xff] %vm227_vm0, %v582_v44  ;;  %v535_v47 = vpop.f32.mrf.mxu2  ;;  %v555_v48 = vpop.f32.mrf.mxu3  ;;  %v289_v44 = vld [vmem:[#allocation2 + $0xe8] sm:$0xff] }
  0xb9   : > { %v590_v49 = vadd.f32 %v535_v47, %v277_v45  ;;  %v598_v50 = vadd.f32 %v555_v48, %v285_v46  ;;  %v498_v51 = vpop.f32.mrf.mxu0  ;;  %v518_v52 = vpop.f32.mrf.mxu1 }
  0xba   : > { %v657_v53 = vld [vmem:[#allocation2 + $0x80] sm:$0xff]  ;;  %v575_v57 = vadd.f32 %v498_v51, %v262_v54  ;;  %v583_v59 = vadd.f32 %v518_v52, %v270_v55  ;;  %v266_v54 = vld [vmem:[#allocation2 + $0x30] sm:$0xff] }
  0xbb   : > { %689 = vst.msk [vmem:[%s1123_s18 + $0x80] sm:$0xff] %vm227_vm0, %v657_v53  ;;  %v274_v55 = vld [vmem:[#allocation2 + $0x70] sm:$0xff] }
  0xbc   : > { %623 = vst.msk [vmem:[#allocation2 + $0x88] sm:$0xff] %vm227_vm0, %v590_v49 }
  0xbd   : > { %v665_v56 = vld [vmem:[#allocation2 + $0xc0] sm:$0xff]  ;;  %631 = vst.msk [vmem:[#allocation2 + $0xc8] sm:$0xff] %vm227_vm0, %v598_v50 }
  0xbe   : > { %697 = vst.msk [vmem:[%s1123_s18 + $0xc0] sm:$0xff] %vm227_vm0, %v665_v56  ;;  %v642_v58 = vld [vmem:[#allocation2 + $0x8] sm:$0xff] }
  0xbf   : > { %674 = vst.msk [vmem:[%s1123_s18 + $0x8] sm:$0xff] %vm227_vm0, %v642_v58  ;;  %v650_v61 = vld [vmem:[#allocation2 + $0x48] sm:$0xff] }
  0xc0   : > { %682 = vst.msk [vmem:[%s1123_s18 + $0x48] sm:$0xff] %vm227_vm0, %v650_v61  ;;  %v538_v63 = vpop.f32.mrf.mxu2  ;;  %v558_v0 = vpop.f32.mrf.mxu3 }
  0xc1   : > { %608 = vst.msk [vmem:[#allocation2 + $0x10] sm:$0xff] %vm227_vm0, %v575_v57  ;;  %v591_v2 = vadd.f32 %v538_v63, %v278_v60  ;;  %v500_v3 = vpop.f32.mrf.mxu0  ;;  %v520_v5 = vpop.f32.mrf.mxu1  ;;  %v599_v6 = vadd.f32 %v558_v0, %v286_v62  ;;  %v282_v60 = vld [vmem:[#allocation2 + $0xb0] sm:$0xff] }
  0xc2   : > { %616 = vst.msk [vmem:[#allocation2 + $0x50] sm:$0xff] %vm227_vm0, %v583_v59  ;;  %v576_v8 = vadd.f32 %v500_v3, %v263_v1  ;;  %v584_v10 = vadd.f32 %v520_v5, %v271_v4  ;;  %v290_v62 = vld [vmem:[#allocation2 + $0xf0] sm:$0xff]  ;;  %v267_v1 = vld [vmem:[#allocation2 + $0x38] sm:$0xff] }
  0xc3   : > { %v658_v7 = vld [vmem:[#allocation2 + $0x88] sm:$0xff]  ;;  %624 = vst.msk [vmem:[#allocation2 + $0x90] sm:$0xff] %vm227_vm0, %v591_v2  ;;  %v275_v4 = vld [vmem:[#allocation2 + $0x78] sm:$0xff] }
  0xc4   : > { %690 = vst.msk [vmem:[%s1123_s18 + $0x88] sm:$0xff] %vm227_vm0, %v658_v7  ;;  %v666_v9 = vld [vmem:[#allocation2 + $0xc8] sm:$0xff] }
  0xc5   : > { %698 = vst.msk [vmem:[%s1123_s18 + $0xc8] sm:$0xff] %vm227_vm0, %v666_v9 }
  0xc6   : > { %632 = vst.msk [vmem:[#allocation2 + $0xd0] sm:$0xff] %vm227_vm0, %v599_v6 }
  0xc7   : > { %609 = vst.msk [vmem:[#allocation2 + $0x18] sm:$0xff] %vm227_vm0, %v576_v8 }
  0xc8   : > { %v643_v13 = vld [vmem:[#allocation2 + $0x10] sm:$0xff]  ;;  %617 = vst.msk [vmem:[#allocation2 + $0x58] sm:$0xff] %vm227_vm0, %v584_v10  ;;  %v540_v14 = vpop.f32.mrf.mxu2  ;;  %v560_v15 = vpop.f32.mrf.mxu3 }
  0xc9   : > { %675 = vst.msk [vmem:[%s1123_s18 + $0x10] sm:$0xff] %vm227_vm0, %v643_v13  ;;  %v651_v16 = vld [vmem:[#allocation2 + $0x50] sm:$0xff]  ;;  %v592_v17 = vadd.f32 %v540_v14, %v279_v11  ;;  %v600_v18 = vadd.f32 %v560_v15, %v287_v12  ;;  %v503_v19 = vpop.f32.mrf.mxu0  ;;  %v523_v20 = vpop.f32.mrf.mxu1  ;;  %v283_v11 = vld [vmem:[#allocation2 + $0xb8] sm:$0xff] }
  0xca   : > { %683 = vst.msk [vmem:[%s1123_s18 + $0x50] sm:$0xff] %vm227_vm0, %v651_v16  ;;  %v659_v21 = vld [vmem:[#allocation2 + $0x90] sm:$0xff]  ;;  %v577_v25 = vadd.f32 %v503_v19, %v264_v22  ;;  %v585_v27 = vadd.f32 %v523_v20, %v272_v23  ;;  %v291_v12 = vld [vmem:[#allocation2 + $0xf8] sm:$0xff] }
  0xcb   : > { %691 = vst.msk [vmem:[%s1123_s18 + $0x90] sm:$0xff] %vm227_vm0, %v659_v21 }
  0xcc   : > { %625 = vst.msk [vmem:[#allocation2 + $0x98] sm:$0xff] %vm227_vm0, %v592_v17 }
  0xcd   : > { %v667_v24 = vld [vmem:[#allocation2 + $0xd0] sm:$0xff]  ;;  %633 = vst.msk [vmem:[#allocation2 + $0xd8] sm:$0xff] %vm227_vm0, %v600_v18 }
  0xce   : > { %699 = vst.msk [vmem:[%s1123_s18 + $0xd0] sm:$0xff] %vm227_vm0, %v667_v24  ;;  %v644_v26 = vld [vmem:[#allocation2 + $0x18] sm:$0xff] }
  0xcf   : > { %676 = vst.msk [vmem:[%s1123_s18 + $0x18] sm:$0xff] %vm227_vm0, %v644_v26  ;;  %v652_v29 = vld [vmem:[#allocation2 + $0x58] sm:$0xff] }
  0xd0   : > { %684 = vst.msk [vmem:[%s1123_s18 + $0x58] sm:$0xff] %vm227_vm0, %v652_v29  ;;  %v543_v31 = vpop.f32.mrf.mxu2  ;;  %v563_v32 = vpop.f32.mrf.mxu3 }
  0xd1   : > { %610 = vst.msk [vmem:[#allocation2 + $0x20] sm:$0xff] %vm227_vm0, %v577_v25  ;;  %v593_v34 = vadd.f32 %v543_v31, %v280_v28  ;;  %v505_v35 = vpop.f32.mrf.mxu0  ;;  %v525_v37 = vpop.f32.mrf.mxu1  ;;  %v601_v38 = vadd.f32 %v563_v32, %v288_v30 }
  0xd2   : > { %618 = vst.msk [vmem:[#allocation2 + $0x60] sm:$0xff] %vm227_vm0, %v585_v27  ;;  %v578_v40 = vadd.f32 %v505_v35, %v265_v33  ;;  %v586_v42 = vadd.f32 %v525_v37, %v273_v36 }
  0xd3   : > { %v660_v39 = vld [vmem:[#allocation2 + $0x98] sm:$0xff]  ;;  %626 = vst.msk [vmem:[#allocation2 + $0xa0] sm:$0xff] %vm227_vm0, %v593_v34 }
  0xd4   : > { %692 = vst.msk [vmem:[%s1123_s18 + $0x98] sm:$0xff] %vm227_vm0, %v660_v39  ;;  %v668_v41 = vld [vmem:[#allocation2 + $0xd8] sm:$0xff] }
  0xd5   : > { %700 = vst.msk [vmem:[%s1123_s18 + $0xd8] sm:$0xff] %vm227_vm0, %v668_v41 }
  0xd6   : > { %634 = vst.msk [vmem:[#allocation2 + $0xe0] sm:$0xff] %vm227_vm0, %v601_v38 }
  0xd7   : > { %611 = vst.msk [vmem:[#allocation2 + $0x28] sm:$0xff] %vm227_vm0, %v578_v40 }
  0xd8   : > { %v645_v45 = vld [vmem:[#allocation2 + $0x20] sm:$0xff]  ;;  %619 = vst.msk [vmem:[#allocation2 + $0x68] sm:$0xff] %vm227_vm0, %v586_v42  ;;  %v545_v46 = vpop.f32.mrf.mxu2  ;;  %v565_v47 = vpop.f32.mrf.mxu3 }
  0xd9   : > { %677 = vst.msk [vmem:[%s1123_s18 + $0x20] sm:$0xff] %vm227_vm0, %v645_v45  ;;  %v653_v48 = vld [vmem:[#allocation2 + $0x60] sm:$0xff]  ;;  %v594_v49 = vadd.f32 %v545_v46, %v281_v43  ;;  %v602_v50 = vadd.f32 %v565_v47, %v289_v44  ;;  %v508_v51 = vpop.f32.mrf.mxu0  ;;  %v528_v52 = vpop.f32.mrf.mxu1 }
  0xda   : > { %685 = vst.msk [vmem:[%s1123_s18 + $0x60] sm:$0xff] %vm227_vm0, %v653_v48  ;;  %v661_v53 = vld [vmem:[#allocation2 + $0xa0] sm:$0xff]  ;;  %v579_v57 = vadd.f32 %v508_v51, %v266_v54  ;;  %v587_v59 = vadd.f32 %v528_v52, %v274_v55 }
  0xdb   : > { %693 = vst.msk [vmem:[%s1123_s18 + $0xa0] sm:$0xff] %vm227_vm0, %v661_v53 }
  0xdc   : > { %627 = vst.msk [vmem:[#allocation2 + $0xa8] sm:$0xff] %vm227_vm0, %v594_v49 }
  0xdd   : > { %v669_v56 = vld [vmem:[#allocation2 + $0xe0] sm:$0xff]  ;;  %635 = vst.msk [vmem:[#allocation2 + $0xe8] sm:$0xff] %vm227_vm0, %v602_v50 }
  0xde   : > { %701 = vst.msk [vmem:[%s1123_s18 + $0xe0] sm:$0xff] %vm227_vm0, %v669_v56  ;;  %v646_v58 = vld [vmem:[#allocation2 + $0x28] sm:$0xff] }
  0xdf   : > { %678 = vst.msk [vmem:[%s1123_s18 + $0x28] sm:$0xff] %vm227_vm0, %v646_v58  ;;  %v654_v61 = vld [vmem:[#allocation2 + $0x68] sm:$0xff] }
  0xe0   : > { %686 = vst.msk [vmem:[%s1123_s18 + $0x68] sm:$0xff] %vm227_vm0, %v654_v61  ;;  %v548_v63 = vpop.f32.mrf.mxu2  ;;  %v568_v0 = vpop.f32.mrf.mxu3 }
  0xe1   : > { %612 = vst.msk [vmem:[#allocation2 + $0x30] sm:$0xff] %vm227_vm0, %v579_v57  ;;  %v595_v2 = vadd.f32 %v548_v63, %v282_v60  ;;  %v510_v3 = vpop.f32.mrf.mxu0  ;;  %v530_v5 = vpop.f32.mrf.mxu1  ;;  %v603_v6 = vadd.f32 %v568_v0, %v290_v62 }
  0xe2   : > { %620 = vst.msk [vmem:[#allocation2 + $0x70] sm:$0xff] %vm227_vm0, %v587_v59  ;;  %v580_v8 = vadd.f32 %v510_v3, %v267_v1  ;;  %v588_v10 = vadd.f32 %v530_v5, %v275_v4 }
  0xe3   : > { %v662_v7 = vld [vmem:[#allocation2 + $0xa8] sm:$0xff]  ;;  %628 = vst.msk [vmem:[#allocation2 + $0xb0] sm:$0xff] %vm227_vm0, %v595_v2 }
  0xe4   : > { %694 = vst.msk [vmem:[%s1123_s18 + $0xa8] sm:$0xff] %vm227_vm0, %v662_v7  ;;  %v670_v9 = vld [vmem:[#allocation2 + $0xe8] sm:$0xff] }
  0xe5   : > { %702 = vst.msk [vmem:[%s1123_s18 + $0xe8] sm:$0xff] %vm227_vm0, %v670_v9 }
  0xe6   : > { %636 = vst.msk [vmem:[#allocation2 + $0xf0] sm:$0xff] %vm227_vm0, %v603_v6 }
  0xe7   : > { %613 = vst.msk [vmem:[#allocation2 + $0x38] sm:$0xff] %vm227_vm0, %v580_v8 }
  0xe8   : > { %v647_v13 = vld [vmem:[#allocation2 + $0x30] sm:$0xff]  ;;  %621 = vst.msk [vmem:[#allocation2 + $0x78] sm:$0xff] %vm227_vm0, %v588_v10  ;;  %v550_v14 = vpop.f32.mrf.mxu2  ;;  %v570_v15 = vpop.f32.mrf.mxu3 }
  0xe9   : > { %679 = vst.msk [vmem:[%s1123_s18 + $0x30] sm:$0xff] %vm227_vm0, %v647_v13  ;;  %v655_v16 = vld [vmem:[#allocation2 + $0x70] sm:$0xff]  ;;  %v596_v17 = vadd.f32 %v550_v14, %v283_v11  ;;  %v604_v18 = vadd.f32 %v570_v15, %v291_v12 }
  0xea   : > { %687 = vst.msk [vmem:[%s1123_s18 + $0x70] sm:$0xff] %vm227_vm0, %v655_v16  ;;  %v663_v19 = vld [vmem:[#allocation2 + $0xb0] sm:$0xff] }
  0xeb   : > { %695 = vst.msk [vmem:[%s1123_s18 + $0xb0] sm:$0xff] %vm227_vm0, %v663_v19 }
  0xec   : > { %629 = vst.msk [vmem:[#allocation2 + $0xb8] sm:$0xff] %vm227_vm0, %v596_v17 }
  0xed   : > { %v671_v20 = vld [vmem:[#allocation2 + $0xf0] sm:$0xff]  ;;  %637 = vst.msk [vmem:[#allocation2 + $0xf8] sm:$0xff] %vm227_vm0, %v604_v18 }
  0xee   : > { %703 = vst.msk [vmem:[%s1123_s18 + $0xf0] sm:$0xff] %vm227_vm0, %v671_v20  ;;  %v648_v21 = vld [vmem:[#allocation2 + $0x38] sm:$0xff] }
  0xef   : > { %680 = vst.msk [vmem:[%s1123_s18 + $0x38] sm:$0xff] %vm227_vm0, %v648_v21  ;;  %v656_v22 = vld [vmem:[#allocation2 + $0x78] sm:$0xff] }
  0xf0   : > { %688 = vst.msk [vmem:[%s1123_s18 + $0x78] sm:$0xff] %vm227_vm0, %v656_v22 }
  0xf3   : > { %v664_v23 = vld [vmem:[#allocation2 + $0xb8] sm:$0xff] }
  0xf4   : > { %696 = vst.msk [vmem:[%s1123_s18 + $0xb8] sm:$0xff] %vm227_vm0, %v664_v23  ;;  %v672_v24 = vld [vmem:[#allocation2 + $0xf8] sm:$0xff] }
  0xf5   : > { %704 = vst.msk [vmem:[%s1123_s18 + $0xf8] sm:$0xff] %vm227_vm0, %v672_v24 }
  0xf6 PF: > { %s13_s14 = sadd.s32 1, %s991_s14   ;;  %s1232_s12 = smov %s987_s13 }
  0xf7   : > { %p10_p5 = scmp.ge.s32.totalorder %s13_s14, 4   ;;  %s1233_s13 = smov %s1235_s15 }
  0xf9   :  { %12 = sbr.rel (!%p10_p5) target bundleno = 2 (0x2), region = 73 }

</bundles_post_ra>
